<compile_context>
chip_gen: v7x
topology: tpu7x:2x2x1
jax: 0.10.0
libtpu: 0.0.40
codegen_flags: <defaults>
</compile_context>

<pallas_src>
import numpy as np
import jax
import jax.numpy as jnp
from jax.experimental import pallas as pl
from jax.experimental.pallas import tpu as pltpu


def _round_up(x, m):
    return ((x + m - 1) // m) * m


# ----------------------------- parameter setup -----------------------------
def transition(N):
    Q = np.arange(N, dtype=np.float64)
    R = (2 * Q + 1)[:, None]
    j, i = np.meshgrid(Q, Q)
    A = np.where(i < j, -1, (-1.0) ** (i - j + 1)) * R
    B = (-1.0) ** Q[:, None] * R
    return A, B


def bilinear_discretize(A, B, dt):
    # Equivalent to scipy.signal.cont2discrete((A, B, C, D), dt, 'bilinear')
    # (alpha = 0.5):  Ad = (I - dt/2 A)^-1 (I + dt/2 A),  Bd = (I - dt/2 A)^-1 dt B
    N = A.shape[0]
    I = np.eye(N)
    ima = I - 0.5 * dt * A
    Ad = np.linalg.solve(ima, I + 0.5 * dt * A)
    Bd = np.linalg.solve(ima, dt * B)
    return Ad, Bd


def build_block_kernel_matrix(Ap, Bp, TT):
    """K (TT*Np, Np+TT) such that vstack([c_1..c_TT]) = K @ vstack([c_0, f_1..f_TT]).

    Row block t (0-based) holds [ A^{t+1} | A^t B | A^{t-1} B | ... | B | 0 ... ].
    Built in float64 for accuracy, returned as float32.  Ap/Bp are the
    (zero-)padded discrete A (Np, Np) and B (Np,).
    """
    Np = Ap.shape[0]
    Ap = Ap.astype(np.float64)
    Bp = Bp.astype(np.float64)
    K = np.zeros((TT * Np, Np + TT), dtype=np.float64)

    # A^j B for j = 0 .. TT-1
    AjB = np.zeros((TT, Np), dtype=np.float64)
    v = Bp.copy()
    for j in range(TT):
        AjB[j] = v
        v = Ap @ v

    Apow = Ap.copy()                                   # A^1
    for t in range(TT):
        K[t * Np:(t + 1) * Np, :Np] = Apow             # A^{t+1}
        for s in range(t + 1):
            K[t * Np:(t + 1) * Np, Np + s] = AjB[t - s]
        Apow = Ap @ Apow
    return K.astype(np.float32)


# TODO(synk): eval_matrix / reconstruct() (Legendre polynomial evaluation) is not
# used by forward(), so it is not implemented here.


# ------------------------------- Pallas kernel ------------------------------
def make_hippo_block_kernel(TT, Np):
    def kernel(x_ref, k_ref, out_ref, z_ref):
        # x_ref  : (TT, TM)         inputs for this time block (rows = timesteps)
        # k_ref  : (TT*Np, Np+TT)   precomputed block-recurrence matrix K
        # out_ref: (TT*Np, TM)      stacked states c_1..c_TT, lane-dense stores
        # z_ref  : (Np+TT, TM)      scratch: rows [0:Np] = carried c_0,
        #                           rows [Np:Np+TT] = this block's inputs
        ti = pl.program_id(1)

        @pl.when(ti == 0)
        def _():
            # Reset the carried state at the start of every batch tile.
            z_ref[...] = jnp.zeros_like(z_ref)

        # Inject this block's inputs below the carried state.
        z_ref[pl.ds(Np, TT), :] = x_ref[...]

        # One MXU-throughput-shaped matmul computes all TT states at once.
        y = jnp.dot(k_ref[...], z_ref[...], preferred_element_type=jnp.float32)
        out_ref[...] = y

        # Carry: next block's c_0 is the last state of this block.
        z_ref[pl.ds(0, Np), :] = y[(TT - 1) * Np:, :]

    return kernel


def hippo_legt_forward(inputs, A, Bvec, *, tt=32, tm=128):
    """inputs: (batch, enc_in, L) -> output: (L, batch, enc_in, N)."""
    Bsz, E, L = inputs.shape
    N = A.shape[0]
    M = Bsz * E

    # Padded / tiled sizes.
    Np = _round_up(N, 8)                       # sublane-aligned state order
    TT = max(8, min(_round_up(tt, 8), _round_up(L, 8)))   # timesteps per block
    TM = tm                                    # lane tile over flattened batch
    Mp = _round_up(max(M, TM), TM)             # lane-padded batch rows
    Lp = _round_up(L, TT)                      # time padded to whole blocks
    Kc = Np + TT                               # contraction dim (mult. of 8)

    # Time-major, flattened + zero-padded batch: (Lp, Mp).  Zero padding is
    # benign: padded lanes/state orders stay exactly zero through the
    # recurrence, padded timesteps are sliced away below.
    x_tm = jnp.transpose(inputs.astype(jnp.float32), (2, 0, 1)).reshape(L, M)
    x_tm = jnp.pad(x_tm, ((0, Lp - L), (0, Mp - M)))

    # Host-side (float64) block-recurrence matrix from the padded A, B.
    A_p = np.zeros((Np, Np), np.float64)
    A_p[:N, :N] = np.asarray(A, dtype=np.float64)
    B_p = np.zeros((Np,), np.float64)
    B_p[:N] = np.asarray(Bvec, dtype=np.float64).reshape(-1)
    K = jnp.asarray(build_block_kernel_matrix(A_p, B_p, TT))   # (TT*Np, Kc)

    grid = (Mp // TM, Lp // TT)

    cost = pl.CostEstimate(
        flops=2 * (Lp // TT) * (Mp // TM) * (TT * Np) * Kc * TM,
        transcendentals=0,
        bytes_accessed=4 * (Lp * Mp + Lp * Np * Mp + TT * Np * Kc),
    )

    out = pl.pallas_call(
        make_hippo_block_kernel(TT, Np),
        out_shape=jax.ShapeDtypeStruct((Lp * Np, Mp), jnp.float32),
        grid_spec=pltpu.PrefetchScalarGridSpec(
            num_scalar_prefetch=0,
            grid=grid,
            in_specs=[
                pl.BlockSpec((TT, TM), lambda mi, ti: (ti, mi)),        # x block
                pl.BlockSpec((TT * Np, Kc), lambda mi, ti: (0, 0)),      # K (resident)
            ],
            out_specs=pl.BlockSpec((TT * Np, TM), lambda mi, ti: (ti, mi)),
            scratch_shapes=[pltpu.VMEM((Kc, TM), jnp.float32)],          # [c_0; f] carry
        ),
        compiler_params=pltpu.CompilerParams(
            # Batch-lane axis is parallel (independent recurrences -> v7x 2-TC
            # shard when Mp/TM >= 2); time axis must stay sequential for the
            # state carry.
            dimension_semantics=("parallel", "arbitrary"),
            vmem_limit_bytes=32 * 1024 * 1024,
        ),
        cost_estimate=cost,
    )(x_tm, K)

    # (Lp*Np, Mp) -> (Lp, Np, Mp) [free leading-dim split] -> (L, M, N)
    out = out.reshape(Lp, Np, Mp)[:L, :N, :M]
    # TODO(synk): if the downstream consumer can take (L, N, M) directly, this
    # transpose (an extra HBM round-trip of the full output) can be dropped.
    out = jnp.transpose(out, (0, 2, 1)).reshape(L, Bsz, E, N)
    return out


# -------------------------------- reference ---------------------------------
def hippo_legt_reference(inputs, A, Bvec):
    A = jnp.asarray(A, jnp.float32)
    Bvec = jnp.asarray(Bvec, jnp.float32)
    Bsz, E, L = inputs.shape
    N = A.shape[0]
    c = jnp.zeros((Bsz, E, N), jnp.float32)
    outs = []
    for t in range(L):
        f = inputs[:, :, t][..., None]                 # (B, E, 1)
        new = f * Bvec[None, None, :]                  # (B, E, N)
        c = jnp.einsum("ben,mn->bem", c, A) + new      # F.linear(c, A) = c @ A^T
        outs.append(c)
    return jnp.stack(outs, axis=0)


# ----------------------------------- main ------------------------------------
if __name__ == "__main__":
    batch, enc_in, L, N = 2, 4, 16, 32
    dt = 1.0 / L

    A_cont, B_cont = transition(N)
    Ad, Bd = bilinear_discretize(A_cont, B_cont, dt)
    Bd = Bd.squeeze(-1)                                # (N,)

    key = jax.random.PRNGKey(0)
    x = jax.random.normal(key, (batch, enc_in, L), dtype=jnp.float32)

    out = hippo_legt_forward(x, Ad, Bd)
    out = jax.block_until_ready(out)

    ref = hippo_legt_reference(x, Ad, Bd)
    assert out.shape == (L, batch, enc_in, N), out.shape
    assert np.allclose(np.asarray(out), np.asarray(ref), atol=1e-3, rtol=1e-3), \
        "mismatch vs reference"

    print("KERNEL_OK")
</pallas_src>

<mosaic_0001>
module attributes {stable_mosaic.version = 11 : i64} {
  func.func @kernel(%arg0: i32, %arg1: i32, %arg2: memref<16x128xf32, #tpu.memory_space<vmem>>, %arg3: memref<512x48xf32, #tpu.memory_space<vmem>>, %arg4: memref<512x128xf32, #tpu.memory_space<vmem>>, %arg5: memref<48x128xf32, #tpu.memory_space<vmem>>) attributes {dimension_semantics = [#tpu.dimension_semantics<parallel>, #tpu.dimension_semantics<arbitrary>], iteration_bounds = array<i64: 1, 1>, scalar_prefetch = 0 : i64, scratch_operands = 1 : i64, tpu.core_type = #tpu.core_type<tc>, window_params = [{transform_indices = @transform_0, window_bounds = array<i64: 16, 128>}, {pipeline_mode = #tpu.pipeline_mode<synchronous>, transform_indices = @transform_1, window_bounds = array<i64: 512, 48>}, {transform_indices = @transform_2, window_bounds = array<i64: 512, 128>}]} {
    %c0_i32 = arith.constant 0 : i32
    %0 = arith.cmpi eq, %arg1, %c0_i32 : i32
    %1 = arith.extui %0 : i1 to i32
    %c0_i32_0 = arith.constant 0 : i32
    %2 = arith.cmpi ne, %1, %c0_i32_0 : i32
    scf.if %2 {
      %cst_11 = arith.constant 0.000000e+00 : f32
      %11 = vector.broadcast %cst_11 : f32 to vector<48x128xf32>
      %c0_12 = arith.constant 0 : index
      %c0_13 = arith.constant 0 : index
      %12 = vector.load %arg5[%c0_12, %c0_13] : memref<48x128xf32, #tpu.memory_space<vmem>>, vector<48x128xf32>
      tpu.vector_store %arg5[%c0_12, %c0_13], %11 {strides = array<i32>} : memref<48x128xf32, #tpu.memory_space<vmem>>, vector<48x128xf32>,
    } else {
    }
    %c0 = arith.constant 0 : index
    %c0_1 = arith.constant 0 : index
    %3 = vector.load %arg2[%c0, %c0_1] : memref<16x128xf32, #tpu.memory_space<vmem>>, vector<16x128xf32>
    %c32 = arith.constant 32 : index
    %c0_2 = arith.constant 0 : index
    %4 = vector.load %arg5[%c32, %c0_2] : memref<48x128xf32, #tpu.memory_space<vmem>>, vector<16x128xf32>
    tpu.vector_store %arg5[%c32, %c0_2], %3 {strides = array<i32>} : memref<48x128xf32, #tpu.memory_space<vmem>>, vector<16x128xf32>,
    %c0_3 = arith.constant 0 : index
    %c0_4 = arith.constant 0 : index
    %5 = vector.load %arg3[%c0_3, %c0_4] : memref<512x48xf32, #tpu.memory_space<vmem>>, vector<512x48xf32>
    %c0_5 = arith.constant 0 : index
    %c0_6 = arith.constant 0 : index
    %6 = vector.load %arg5[%c0_5, %c0_6] : memref<48x128xf32, #tpu.memory_space<vmem>>, vector<48x128xf32>
    %cst = arith.constant dense<0.000000e+00> : vector<512x128xf32>
    %7 = tpu.matmul %5, %6, %cst {dimension_numbers = #tpu.dot_dimension_numbers<[1], [0], [0], [1], [0, 0, 1, 1], [], []>} : vector<512x48xf32>, vector<48x128xf32>, vector<512x128xf32> -> vector<512x128xf32>
    %c0_7 = arith.constant 0 : index
    %c0_8 = arith.constant 0 : index
    %8 = vector.load %arg4[%c0_7, %c0_8] : memref<512x128xf32, #tpu.memory_space<vmem>>, vector<512x128xf32>
    tpu.vector_store %arg4[%c0_7, %c0_8], %7 {strides = array<i32>} : memref<512x128xf32, #tpu.memory_space<vmem>>, vector<512x128xf32>,
    %9 = vector.extract_strided_slice %7 {offsets = [480, 0], sizes = [32, 128], strides = [1, 1]} : vector<512x128xf32> to vector<32x128xf32>
    %c0_9 = arith.constant 0 : index
    %c0_10 = arith.constant 0 : index
    %10 = vector.load %arg5[%c0_9, %c0_10] : memref<48x128xf32, #tpu.memory_space<vmem>>, vector<32x128xf32>
    tpu.vector_store %arg5[%c0_9, %c0_10], %9 {strides = array<i32>} : memref<48x128xf32, #tpu.memory_space<vmem>>, vector<32x128xf32>,
    return
  }
  func.func @transform_0(%arg0: i32, %arg1: i32) -> (i32, i32) {
    %c0_i32 = arith.constant 0 : i32
    return %arg1, %arg0 : i32, i32
  }
  func.func @transform_1(%arg0: i32, %arg1: i32) -> (i32, i32) {
    %c0_i32 = arith.constant 0 : i32
    %c0_i32_0 = arith.constant 0 : i32
    %c0_i32_1 = arith.constant 0 : i32
    return %c0_i32, %c0_i32_0 : i32, i32
  }
  func.func @transform_2(%arg0: i32, %arg1: i32) -> (i32, i32) {
    %c0_i32 = arith.constant 0 : i32
    return %arg1, %arg0 : i32, i32
  }
}

</mosaic_0001>

<bundles_post_ra>
// kernel: tpu_custom_call.1
= control target key start
LH: loop header
LB: loop body
LE: loop exit
PB: predicated region body
PF: predicated region fallthrough
CT: control target
= control target key end

     0   :  { %v1042_v2 = vmov 0.0|0.0   ;;  %vm96_vm0 = vcmask 392192   ;;  %s1335_s0 = inlined_call_operand.vmem [shape: f32[16,128], index: 0, kind: input, shape index: {}]   ;;  %s1336_s1 = inlined_call_operand.vmem [shape: f32[512,48], index: 1, kind: input, shape index: {}]   ;;  %s1337_s2 = inlined_call_operand.hbm [shape: f32[512,128], index: 2, kind: output, shape index: {}]  }
   0x1   :  { %v22_v0 = vld [vmem:[%s1335_s0] sm:$0xff]  ;;  %v23_v1 = vld [vmem:[%s1335_s0 + $0x8] sm:$0xff]  ;;  %1000 = vmatprep.subr.bf16.mxu0 %v1042_v2  ;;  %1008 = vmatprep.subr.bf16.mxu1 %v1042_v2  ;;  %v28_v8 = vld [vmem:[%s1336_s1 + $0x10] sm:$0xff] }
   0x2   :  { %v26_v3 = vld [vmem:[%s1336_s1] sm:$0xff]  ;;  %1001 = vmatpush3.bf16.msra.mxu0 %v1042_v2  ;;  %1011 = vmatpush3.bf16.msra.mxu1 %v1042_v2  ;;  %v1004_v5 = vpack.c.bf16 %v23_v1, %v22_v0  ;;  %v27_v6 = vld [vmem:[%s1336_s1 + $0x8] sm:$0xff]  ;;  %v60_v9 = vld [vmem:[%s1336_s1 + $0x110] sm:$0xff] }
   0x3   :  { %v58_v4 = vld [vmem:[%s1336_s1 + $0x100] sm:$0xff]  ;;  %1002 = vmatprep.subr.bf16.mxu0 %v1042_v2  ;;  %1009 = vmatprep.subr.bf16.mxu1 %v1042_v2  ;;  %v59_v7 = vld [vmem:[%s1336_s1 + $0x108] sm:$0xff]  ;;  %v29_v10 = vld [vmem:[%s1336_s1 + $0x18] sm:$0xff] }
   0x4   :  { %904 = vmatprep.mubr.msk.f32.mxu0 %vm96_vm0, %v26_v3  ;;  %952 = vmatprep.mubr.msk.f32.mxu1 %vm96_vm0, %v58_v4  ;;  %v61_v11 = vld [vmem:[%s1336_s1 + $0x118] sm:$0xff]  ;;  %v30_v12 = vld [vmem:[%s1336_s1 + $0x20] sm:$0xff]  ;;  %v31_v14 = vld [vmem:[%s1336_s1 + $0x28] sm:$0xff] }
   0x5   :  { %v62_v13 = vld [vmem:[%s1336_s1 + $0x120] sm:$0xff]  ;;  %v63_v15 = vld [vmem:[%s1336_s1 + $0x128] sm:$0xff]  ;;  %v32_v16 = vld [vmem:[%s1336_s1 + $0x30] sm:$0xff] }
   0x6   :  { %1003 = vmatpush3.bf16.msra.mxu0 %v1042_v2  ;;  %1012 = vmatpush3.bf16.msra.mxu1 %v1042_v2  ;;  %v64_v17 = vld [vmem:[%s1336_s1 + $0x130] sm:$0xff]  ;;  %v33_v18 = vld [vmem:[%s1336_s1 + $0x38] sm:$0xff] }
   0x7   :  { %1005 = vmatprep.subr.bf16.mxu0 %v1004_v5  ;;  %1010 = vmatprep.subr.bf16.mxu1 %v1004_v5  ;;  %v65_v19 = vld [vmem:[%s1336_s1 + $0x138] sm:$0xff] }
   0xa   :  { %1007 = vmatpush3.bf16.msra.mxu0 %v1004_v5  ;;  %1013 = vmatpush3.bf16.msra.mxu1 %v1004_v5 }
   0xd   :  { %905 = vmatmul.mubr.msk.f32.vlgmr.msra.gmra.mrb[0].mxu0 %vm96_vm0, %v27_v6  ;;  %953 = vmatmul.mubr.msk.f32.vlgmr.msra.gmra.mrb[0].mxu1 %vm96_vm0, %v59_v7 }
   0xe   :  { %907 = vmatprep.mubr.msk.f32.mxu0 %vm96_vm0, %v28_v8  ;;  %955 = vmatprep.mubr.msk.f32.mxu1 %vm96_vm0, %v60_v9 }
  0x11   :  { %908 = vmatmul.mubr.msk.f32.gmra.mrb[2].mxu0 %vm96_vm0, %v29_v10  ;;  %956 = vmatmul.mubr.msk.f32.gmra.mrb[2].mxu1 %vm96_vm0, %v61_v11 }
  0x12   :  { %910 = vmatprep.mubr.msk.f32.mxu0 %vm96_vm0, %v30_v12  ;;  %958 = vmatprep.mubr.msk.f32.mxu1 %vm96_vm0, %v62_v13 }
  0x15   :  { %911 = vmatmul.mubr.msk.f32.gmra.mrb[4].mxu0 %vm96_vm0, %v31_v14  ;;  %959 = vmatmul.mubr.msk.f32.gmra.mrb[4].mxu1 %vm96_vm0, %v63_v15 }
  0x16   :  { %913 = vmatprep.mubr.msk.f32.mxu0 %vm96_vm0, %v32_v16  ;;  %961 = vmatprep.mubr.msk.f32.mxu1 %vm96_vm0, %v64_v17 }
  0x17   :  { %7 = vsyncpa [#allocation4], 0  ;;  %v34_v20 = vld [vmem:[%s1336_s1 + $0x40] sm:$0xff]  ;;  %v35_v22 = vld [vmem:[%s1336_s1 + $0x48] sm:$0xff] }
  0x18   :  { %v66_v21 = vld [vmem:[%s1336_s1 + $0x140] sm:$0xff]  ;;  %v67_v23 = vld [vmem:[%s1336_s1 + $0x148] sm:$0xff]  ;;  %v36_v24 = vld [vmem:[%s1336_s1 + $0x50] sm:$0xff] }
  0x19   :  { %914 = vmatmul.mubr.msk.f32.gmra.mrb[6].mxu0 %vm96_vm0, %v33_v18  ;;  %962 = vmatmul.mubr.msk.f32.gmra.mrb[6].mxu1 %vm96_vm0, %v65_v19  ;;  %v68_v25 = vld [vmem:[%s1336_s1 + $0x150] sm:$0xff]  ;;  %v37_v26 = vld [vmem:[%s1336_s1 + $0x58] sm:$0xff]  ;;  %v38_v28 = vld [vmem:[%s1336_s1 + $0x60] sm:$0xff] }
  0x1a   :  { %916 = vmatprep.mubr.msk.f32.mxu0 %vm96_vm0, %v34_v20  ;;  %964 = vmatprep.mubr.msk.f32.mxu1 %vm96_vm0, %v66_v21  ;;  %v69_v27 = vld [vmem:[%s1336_s1 + $0x158] sm:$0xff]  ;;  %v70_v29 = vld [vmem:[%s1336_s1 + $0x160] sm:$0xff]  ;;  %v39_v30 = vld [vmem:[%s1336_s1 + $0x68] sm:$0xff] }
  0x1b   :  { %v71_v31 = vld [vmem:[%s1336_s1 + $0x168] sm:$0xff]  ;;  %v40_v32 = vld [vmem:[%s1336_s1 + $0x70] sm:$0xff]  ;;  %v41_v34 = vld [vmem:[%s1336_s1 + $0x78] sm:$0xff] }
  0x1c   :  { %v72_v33 = vld [vmem:[%s1336_s1 + $0x170] sm:$0xff]  ;;  %v73_v35 = vld [vmem:[%s1336_s1 + $0x178] sm:$0xff]  ;;  %v42_v36 = vld [vmem:[%s1336_s1 + $0x80] sm:$0xff] }
  0x1d   :  { %917 = vmatmul.mubr.msk.f32.gmra.mrb[8].mxu0 %vm96_vm0, %v35_v22  ;;  %965 = vmatmul.mubr.msk.f32.gmra.mrb[8].mxu1 %vm96_vm0, %v67_v23  ;;  %v74_v37 = vld [vmem:[%s1336_s1 + $0x180] sm:$0xff]  ;;  %v43_v38 = vld [vmem:[%s1336_s1 + $0x88] sm:$0xff]  ;;  %v44_v40 = vld [vmem:[%s1336_s1 + $0x90] sm:$0xff] }
  0x1e   :  { %919 = vmatprep.mubr.msk.f32.mxu0 %vm96_vm0, %v36_v24  ;;  %967 = vmatprep.mubr.msk.f32.mxu1 %vm96_vm0, %v68_v25  ;;  %v75_v39 = vld [vmem:[%s1336_s1 + $0x188] sm:$0xff]  ;;  %v76_v41 = vld [vmem:[%s1336_s1 + $0x190] sm:$0xff]  ;;  %v45_v42 = vld [vmem:[%s1336_s1 + $0x98] sm:$0xff] }
  0x1f   :  { %v77_v43 = vld [vmem:[%s1336_s1 + $0x198] sm:$0xff]  ;;  %v46_v44 = vld [vmem:[%s1336_s1 + $0xa0] sm:$0xff]  ;;  %v47_v46 = vld [vmem:[%s1336_s1 + $0xa8] sm:$0xff] }
  0x20   :  { %v78_v45 = vld [vmem:[%s1336_s1 + $0x1a0] sm:$0xff]  ;;  %v79_v47 = vld [vmem:[%s1336_s1 + $0x1a8] sm:$0xff]  ;;  %v48_v48 = vld [vmem:[%s1336_s1 + $0xb0] sm:$0xff] }
  0x21   :  { %920 = vmatmul.mubr.msk.f32.gmra.mrb[10].mxu0 %vm96_vm0, %v37_v26  ;;  %968 = vmatmul.mubr.msk.f32.gmra.mrb[10].mxu1 %vm96_vm0, %v69_v27  ;;  %v80_v49 = vld [vmem:[%s1336_s1 + $0x1b0] sm:$0xff]  ;;  %v49_v50 = vld [vmem:[%s1336_s1 + $0xb8] sm:$0xff]  ;;  %v50_v52 = vld [vmem:[%s1336_s1 + $0xc0] sm:$0xff] }
  0x22   :  { %922 = vmatprep.mubr.msk.f32.mxu0 %vm96_vm0, %v38_v28  ;;  %970 = vmatprep.mubr.msk.f32.mxu1 %vm96_vm0, %v70_v29  ;;  %v81_v51 = vld [vmem:[%s1336_s1 + $0x1b8] sm:$0xff]  ;;  %v82_v53 = vld [vmem:[%s1336_s1 + $0x1c0] sm:$0xff]  ;;  %v51_v54 = vld [vmem:[%s1336_s1 + $0xc8] sm:$0xff] }
  0x23   :  { %v83_v55 = vld [vmem:[%s1336_s1 + $0x1c8] sm:$0xff]  ;;  %v52_v56 = vld [vmem:[%s1336_s1 + $0xd0] sm:$0xff]  ;;  %v53_v58 = vld [vmem:[%s1336_s1 + $0xd8] sm:$0xff] }
  0x24   :  { %v84_v57 = vld [vmem:[%s1336_s1 + $0x1d0] sm:$0xff]  ;;  %v85_v59 = vld [vmem:[%s1336_s1 + $0x1d8] sm:$0xff]  ;;  %v54_v60 = vld [vmem:[%s1336_s1 + $0xe0] sm:$0xff] }
  0x25   :  { %923 = vmatmul.mubr.msk.f32.gmra.mrb[12].mxu0 %vm96_vm0, %v39_v30  ;;  %971 = vmatmul.mubr.msk.f32.gmra.mrb[12].mxu1 %vm96_vm0, %v71_v31  ;;  %v86_v61 = vld [vmem:[%s1336_s1 + $0x1e0] sm:$0xff]  ;;  %v55_v62 = vld [vmem:[%s1336_s1 + $0xe8] sm:$0xff]  ;;  %v56_v0 = vld [vmem:[%s1336_s1 + $0xf0] sm:$0xff] }
  0x26   :  { %925 = vmatprep.mubr.msk.f32.mxu0 %vm96_vm0, %v40_v32  ;;  %973 = vmatprep.mubr.msk.f32.mxu1 %vm96_vm0, %v72_v33  ;;  %v87_v63 = vld [vmem:[%s1336_s1 + $0x1e8] sm:$0xff]  ;;  %v88_v1 = vld [vmem:[%s1336_s1 + $0x1f0] sm:$0xff]  ;;  %v57_v2 = vld [vmem:[%s1336_s1 + $0xf8] sm:$0xff] }
  0x27   :  { %v89_v3 = vld [vmem:[%s1336_s1 + $0x1f8] sm:$0xff]  ;;  %s1043_s1 = smov [#allocation3]  }
  0x28   :  { %s747_s24 = sshll.u32 %s1043_s1, 4  ;;  %s748_s24 = int_to_ptr.vmem [resolvable:$true] %s747_s24 }
  0x29   :  { %926 = vmatmul.mubr.msk.f32.gmra.mrb[14].mxu0 %vm96_vm0, %v41_v34  ;;  %974 = vmatmul.mubr.msk.f32.gmra.mrb[14].mxu1 %vm96_vm0, %v73_v35  ;;  %s1018_s25 = scalar_lea.vmem %s748_s24, 8192  ;;  %p1023_p1 = scmp.lt.s32.totalorder %s748_s24, %s748_s24 }
  0x2a   :  { %928 = vmatprep.mubr.msk.f32.mxu0 %vm96_vm0, %v42_v36  ;;  %976 = vmatprep.mubr.msk.f32.mxu1 %vm96_vm0, %v74_v37  ;;  %p1019_p0 = scmp.ne.s32.totalorder %s748_s24, %s1018_s25  ;;  %p1024_p2 = scmp.lt.s32.totalorder %s1018_s25, %s1018_s25 }
  0x2c   :  { %p1025_p3 = por %p1024_p2, %p1023_p1 }
  0x2d   :  { %929 = vmatmul.mubr.msk.f32.gmra.mrb[16].mxu0 %vm96_vm0, %v43_v38  ;;  %977 = vmatmul.mubr.msk.f32.gmra.mrb[16].mxu1 %vm96_vm0, %v75_v39 }
  0x2e   :  { %931 = vmatprep.mubr.msk.f32.mxu0 %vm96_vm0, %v44_v40  ;;  %979 = vmatprep.mubr.msk.f32.mxu1 %vm96_vm0, %v76_v41  ;;  %p1026_p4 = pnand %p1025_p3, %p1019_p0 }
  0x31   :  { %932 = vmatmul.mubr.msk.f32.gmra.mrb[18].mxu0 %vm96_vm0, %v45_v42  ;;  %980 = vmatmul.mubr.msk.f32.gmra.mrb[18].mxu1 %vm96_vm0, %v77_v43 }
  0x32   :  { %934 = vmatprep.mubr.msk.f32.mxu0 %vm96_vm0, %v46_v44  ;;  %982 = vmatprep.mubr.msk.f32.mxu1 %vm96_vm0, %v78_v45 }
  0x35   :  { %935 = vmatmul.mubr.msk.f32.gmra.mrb[20].mxu0 %vm96_vm0, %v47_v46  ;;  %983 = vmatmul.mubr.msk.f32.gmra.mrb[20].mxu1 %vm96_vm0, %v79_v47 }
  0x36   :  { %937 = vmatprep.mubr.msk.f32.mxu0 %vm96_vm0, %v48_v48  ;;  %985 = vmatprep.mubr.msk.f32.mxu1 %vm96_vm0, %v80_v49 }
  0x39   :  { %938 = vmatmul.mubr.msk.f32.gmra.mrb[22].mxu0 %vm96_vm0, %v49_v50  ;;  %986 = vmatmul.mubr.msk.f32.gmra.mrb[22].mxu1 %vm96_vm0, %v81_v51 }
  0x3a   :  { %940 = vmatprep.mubr.msk.f32.mxu0 %vm96_vm0, %v50_v52  ;;  %988 = vmatprep.mubr.msk.f32.mxu1 %vm96_vm0, %v82_v53 }
  0x3d   :  { %941 = vmatmul.mubr.msk.f32.gmra.mrb[24].mxu0 %vm96_vm0, %v51_v54  ;;  %989 = vmatmul.mubr.msk.f32.gmra.mrb[24].mxu1 %vm96_vm0, %v83_v55 }
  0x3e   :  { %943 = vmatprep.mubr.msk.f32.mxu0 %vm96_vm0, %v52_v56  ;;  %991 = vmatprep.mubr.msk.f32.mxu1 %vm96_vm0, %v84_v57 }
  0x41   :  { %944 = vmatmul.mubr.msk.f32.gmra.mrb[26].mxu0 %vm96_vm0, %v53_v58  ;;  %992 = vmatmul.mubr.msk.f32.gmra.mrb[26].mxu1 %vm96_vm0, %v85_v59 }
  0x42   :  { %946 = vmatprep.mubr.msk.f32.mxu0 %vm96_vm0, %v54_v60  ;;  %994 = vmatprep.mubr.msk.f32.mxu1 %vm96_vm0, %v86_v61 }
  0x45   :  { %947 = vmatmul.mubr.msk.f32.gmra.mrb[28].mxu0 %vm96_vm0, %v55_v62  ;;  %995 = vmatmul.mubr.msk.f32.gmra.mrb[28].mxu1 %vm96_vm0, %v87_v63 }
  0x46   :  { %949 = vmatprep.mubr.msk.f32.mxu0 %vm96_vm0, %v56_v0  ;;  %997 = vmatprep.mubr.msk.f32.mxu1 %vm96_vm0, %v88_v1 }
  0x49   :  { %950 = vmatmul.mubr.msk.f32.gmra.mrb[30].mxu0 %vm96_vm0, %v57_v2  ;;  %998 = vmatmul.mubr.msk.f32.gmra.mrb[30].mxu1 %vm96_vm0, %v89_v3 }
  0xe0   :  { %v906_v4 = vpop.f32.mrb[0].mxu0  ;;  %v954_v5 = vpop.f32.mrb[0].mxu1 }
  0xe1   :  { %675 = vst [vmem:[#allocation3 + $0x8] sm:$0xff] %v906_v4  ;;  %707 = vst [vmem:[#allocation3 + $0x108] sm:$0xff] %v954_v5  ;;  %v355_v6 = vpop.f32.mrb[1].mxu0  ;;  %v515_v7 = vpop.f32.mrb[1].mxu1 }
  0xe2   :  { %674 = vst [vmem:[#allocation3] sm:$0xff] %v355_v6  ;;  %706 = vst [vmem:[#allocation3 + $0x100] sm:$0xff] %v515_v7 }
  0xe4   :  { %v909_v8 = vpop.f32.mrb[2].mxu0  ;;  %v957_v9 = vpop.f32.mrb[2].mxu1 }
  0xe5   :  { %677 = vst [vmem:[#allocation3 + $0x18] sm:$0xff] %v909_v8  ;;  %709 = vst [vmem:[#allocation3 + $0x118] sm:$0xff] %v957_v9  ;;  %v365_v10 = vpop.f32.mrb[3].mxu0  ;;  %v525_v11 = vpop.f32.mrb[3].mxu1 }
  0xe6   :  { %676 = vst [vmem:[#allocation3 + $0x10] sm:$0xff] %v365_v10  ;;  %708 = vst [vmem:[#allocation3 + $0x110] sm:$0xff] %v525_v11 }
  0xe8   :  { %v912_v12 = vpop.f32.mrb[4].mxu0  ;;  %v960_v13 = vpop.f32.mrb[4].mxu1 }
  0xe9   :  { %679 = vst [vmem:[#allocation3 + $0x28] sm:$0xff] %v912_v12  ;;  %711 = vst [vmem:[#allocation3 + $0x128] sm:$0xff] %v960_v13  ;;  %v375_v14 = vpop.f32.mrb[5].mxu0  ;;  %v535_v15 = vpop.f32.mrb[5].mxu1 }
  0xea   :  { %678 = vst [vmem:[#allocation3 + $0x20] sm:$0xff] %v375_v14  ;;  %710 = vst [vmem:[#allocation3 + $0x120] sm:$0xff] %v535_v15 }
  0xec   :  { %v915_v16 = vpop.f32.mrb[6].mxu0  ;;  %v963_v17 = vpop.f32.mrb[6].mxu1 }
  0xed   :  { %681 = vst [vmem:[#allocation3 + $0x38] sm:$0xff] %v915_v16  ;;  %713 = vst [vmem:[#allocation3 + $0x138] sm:$0xff] %v963_v17  ;;  %v385_v18 = vpop.f32.mrb[7].mxu0  ;;  %v545_v19 = vpop.f32.mrb[7].mxu1 }
  0xee   :  { %680 = vst [vmem:[#allocation3 + $0x30] sm:$0xff] %v385_v18  ;;  %712 = vst [vmem:[#allocation3 + $0x130] sm:$0xff] %v545_v19 }
  0xf0   :  { %v918_v20 = vpop.f32.mrb[8].mxu0  ;;  %v966_v21 = vpop.f32.mrb[8].mxu1 }
  0xf1   :  { %683 = vst [vmem:[#allocation3 + $0x48] sm:$0xff] %v918_v20  ;;  %715 = vst [vmem:[#allocation3 + $0x148] sm:$0xff] %v966_v21  ;;  %v395_v22 = vpop.f32.mrb[9].mxu0  ;;  %v555_v23 = vpop.f32.mrb[9].mxu1 }
  0xf2   :  { %682 = vst [vmem:[#allocation3 + $0x40] sm:$0xff] %v395_v22  ;;  %714 = vst [vmem:[#allocation3 + $0x140] sm:$0xff] %v555_v23 }
  0xf4   :  { %v921_v24 = vpop.f32.mrb[10].mxu0  ;;  %v969_v25 = vpop.f32.mrb[10].mxu1 }
  0xf5   :  { %685 = vst [vmem:[#allocation3 + $0x58] sm:$0xff] %v921_v24  ;;  %717 = vst [vmem:[#allocation3 + $0x158] sm:$0xff] %v969_v25  ;;  %v405_v26 = vpop.f32.mrb[11].mxu0  ;;  %v565_v27 = vpop.f32.mrb[11].mxu1 }
  0xf6   :  { %684 = vst [vmem:[#allocation3 + $0x50] sm:$0xff] %v405_v26  ;;  %716 = vst [vmem:[#allocation3 + $0x150] sm:$0xff] %v565_v27 }
  0xf8   :  { %v924_v28 = vpop.f32.mrb[12].mxu0  ;;  %v972_v29 = vpop.f32.mrb[12].mxu1 }
  0xf9   :  { %687 = vst [vmem:[#allocation3 + $0x68] sm:$0xff] %v924_v28  ;;  %719 = vst [vmem:[#allocation3 + $0x168] sm:$0xff] %v972_v29  ;;  %v415_v30 = vpop.f32.mrb[13].mxu0  ;;  %v575_v31 = vpop.f32.mrb[13].mxu1 }
  0xfa   :  { %686 = vst [vmem:[#allocation3 + $0x60] sm:$0xff] %v415_v30  ;;  %718 = vst [vmem:[#allocation3 + $0x160] sm:$0xff] %v575_v31 }
  0xfc   :  { %v927_v32 = vpop.f32.mrb[14].mxu0  ;;  %v975_v33 = vpop.f32.mrb[14].mxu1 }
  0xfd   :  { %689 = vst [vmem:[#allocation3 + $0x78] sm:$0xff] %v927_v32  ;;  %721 = vst [vmem:[#allocation3 + $0x178] sm:$0xff] %v975_v33  ;;  %v425_v34 = vpop.f32.mrb[15].mxu0  ;;  %v585_v35 = vpop.f32.mrb[15].mxu1 }
  0xfe   :  { %688 = vst [vmem:[#allocation3 + $0x70] sm:$0xff] %v425_v34  ;;  %720 = vst [vmem:[#allocation3 + $0x170] sm:$0xff] %v585_v35 }
 0x100   :  { %v930_v36 = vpop.f32.mrb[16].mxu0  ;;  %v978_v37 = vpop.f32.mrb[16].mxu1 }
 0x101   :  { %691 = vst [vmem:[#allocation3 + $0x88] sm:$0xff] %v930_v36  ;;  %723 = vst [vmem:[#allocation3 + $0x188] sm:$0xff] %v978_v37  ;;  %v435_v38 = vpop.f32.mrb[17].mxu0  ;;  %v595_v39 = vpop.f32.mrb[17].mxu1 }
 0x102   :  { %690 = vst [vmem:[#allocation3 + $0x80] sm:$0xff] %v435_v38  ;;  %722 = vst [vmem:[#allocation3 + $0x180] sm:$0xff] %v595_v39 }
 0x104   :  { %v933_v40 = vpop.f32.mrb[18].mxu0  ;;  %v981_v41 = vpop.f32.mrb[18].mxu1 }
 0x105   :  { %693 = vst [vmem:[#allocation3 + $0x98] sm:$0xff] %v933_v40  ;;  %725 = vst [vmem:[#allocation3 + $0x198] sm:$0xff] %v981_v41  ;;  %v445_v42 = vpop.f32.mrb[19].mxu0  ;;  %v605_v43 = vpop.f32.mrb[19].mxu1 }
 0x106   :  { %692 = vst [vmem:[#allocation3 + $0x90] sm:$0xff] %v445_v42  ;;  %724 = vst [vmem:[#allocation3 + $0x190] sm:$0xff] %v605_v43 }
 0x108   :  { %v936_v44 = vpop.f32.mrb[20].mxu0  ;;  %v984_v45 = vpop.f32.mrb[20].mxu1 }
 0x109   :  { %695 = vst [vmem:[#allocation3 + $0xa8] sm:$0xff] %v936_v44  ;;  %727 = vst [vmem:[#allocation3 + $0x1a8] sm:$0xff] %v984_v45  ;;  %v455_v46 = vpop.f32.mrb[21].mxu0  ;;  %v615_v47 = vpop.f32.mrb[21].mxu1 }
 0x10a   :  { %694 = vst [vmem:[#allocation3 + $0xa0] sm:$0xff] %v455_v46  ;;  %726 = vst [vmem:[#allocation3 + $0x1a0] sm:$0xff] %v615_v47 }
 0x10c   :  { %v939_v48 = vpop.f32.mrb[22].mxu0  ;;  %v987_v49 = vpop.f32.mrb[22].mxu1 }
 0x10d   :  { %697 = vst [vmem:[#allocation3 + $0xb8] sm:$0xff] %v939_v48  ;;  %729 = vst [vmem:[#allocation3 + $0x1b8] sm:$0xff] %v987_v49  ;;  %v465_v50 = vpop.f32.mrb[23].mxu0  ;;  %v625_v51 = vpop.f32.mrb[23].mxu1 }
 0x10e   :  { %696 = vst [vmem:[#allocation3 + $0xb0] sm:$0xff] %v465_v50  ;;  %728 = vst [vmem:[#allocation3 + $0x1b0] sm:$0xff] %v625_v51 }
 0x110   :  { %v942_v52 = vpop.f32.mrb[24].mxu0  ;;  %v990_v53 = vpop.f32.mrb[24].mxu1 }
 0x111   :  { %699 = vst [vmem:[#allocation3 + $0xc8] sm:$0xff] %v942_v52  ;;  %731 = vst [vmem:[#allocation3 + $0x1c8] sm:$0xff] %v990_v53  ;;  %v475_v54 = vpop.f32.mrb[25].mxu0  ;;  %v635_v55 = vpop.f32.mrb[25].mxu1 }
 0x112   :  { %698 = vst [vmem:[#allocation3 + $0xc0] sm:$0xff] %v475_v54  ;;  %730 = vst [vmem:[#allocation3 + $0x1c0] sm:$0xff] %v635_v55 }
 0x114   :  { %v945_v56 = vpop.f32.mrb[26].mxu0  ;;  %v993_v57 = vpop.f32.mrb[26].mxu1 }
 0x115   :  { %701 = vst [vmem:[#allocation3 + $0xd8] sm:$0xff] %v945_v56  ;;  %733 = vst [vmem:[#allocation3 + $0x1d8] sm:$0xff] %v993_v57  ;;  %v485_v58 = vpop.f32.mrb[27].mxu0  ;;  %v645_v59 = vpop.f32.mrb[27].mxu1 }
 0x116   :  { %700 = vst [vmem:[#allocation3 + $0xd0] sm:$0xff] %v485_v58  ;;  %732 = vst [vmem:[#allocation3 + $0x1d0] sm:$0xff] %v645_v59 }
 0x118   :  { %v948_v60 = vpop.f32.mrb[28].mxu0  ;;  %v996_v61 = vpop.f32.mrb[28].mxu1 }
 0x119   :  { %703 = vst [vmem:[#allocation3 + $0xe8] sm:$0xff] %v948_v60  ;;  %735 = vst [vmem:[#allocation3 + $0x1e8] sm:$0xff] %v996_v61  ;;  %v495_v62 = vpop.f32.mrb[29].mxu0  ;;  %v655_v63 = vpop.f32.mrb[29].mxu1 }
 0x11a   :  { %702 = vst [vmem:[#allocation3 + $0xe0] sm:$0xff] %v495_v62  ;;  %734 = vst [vmem:[#allocation3 + $0x1e0] sm:$0xff] %v655_v63 }
 0x11c   :  { %v951_v0 = vpop.f32.mrb[30].mxu0  ;;  %v999_v1 = vpop.f32.mrb[30].mxu1 }
 0x11d   :  { %705 = vst [vmem:[#allocation3 + $0xf8] sm:$0xff] %v951_v0  ;;  %737 = vst [vmem:[#allocation3 + $0x1f8] sm:$0xff] %v999_v1  ;;  %v505_v2 = vpop.f32.mrb[31].mxu0  ;;  %v665_v3 = vpop.f32.mrb[31].mxu1 }
 0x11e   :  { %704 = vst [vmem:[#allocation3 + $0xf0] sm:$0xff] %v505_v2  ;;  %736 = vst [vmem:[#allocation3 + $0x1f0] sm:$0xff] %v665_v3 }
 0x11f   :  { %1029 = shalt.err (!%p1026_p4)
}
 0x120   :  { %s1030_s28 = scalar_lea.hbm %s1337_s2, 8192 }
 0x121   :  { %p1031_p5 = scmp.ne.s32.totalorder %s1337_s2, %s1030_s28  ;;  %p1034_p6 = scmp.lt.u32.totalorder %s1030_s28, %s1337_s2 }
 0x123   :  { %p1036_p7 = pnand %p1034_p6, %p1031_p5 }
 0x125   :  { %1039 = shalt.err (!%p1036_p7)
}
 0x126   :  { %s1044_s5 = smov 128   ;;  %s1045_s6 = smov 8  }
 0x127   :  { %753 = dma.vmem_to_hbm [thread:$0]  %s748_s24, 8192, %s1337_s2, [#allocation4], %s1044_s5, %s1044_s5, %s1045_s6  }
 0x128   :  { %1040 = dma.done.wait [#allocation4], 8192  }
 0x129   :  { %1041 = vsyncadd [#allocation4], 4294959104 }
 0x12a   :  { %757 = vsyncpa [#allocation4], 1 }

</bundles_post_ra>
